<compile_context>
chip_gen: v5e
topology: v5e:2x2
jax: 0.10.0
libtpu: 0.0.40
codegen_flags: <defaults>
</compile_context>

<pallas_src>
import functools

import jax
import jax.numpy as jnp
from jax.experimental import pallas as pl
from jax.experimental.pallas import tpu as pltpu


def _round_up(x, m):
    return ((x + m - 1) // m) * m


def _cdiv(a, b):
    return (a + b - 1) // b


def _default_act_dtype():
    """bf16 elementwise math on chips with a bf16 VPU/EUP (v6e/v7x), else f32."""
    try:
        kind = jax.devices()[0].device_kind.lower()
    except Exception:  # pragma: no cover - defensive
        return jnp.float32
    if ("v6" in kind) or ("v7" in kind) or ("7x" in kind):
        return jnp.bfloat16
    return jnp.float32


def _sigmoid(x):
    # sigmoid(x) = 0.5 * (1 + tanh(0.5 * x)) : one EUP op, no exp + divide.
    return 0.5 * jnp.tanh(0.5 * x) + 0.5


def _actor_math(x, w1, b1, w2, b2, w3, b3, w4, b4):
    """Shared forward math (used by the kernel, the dense fallback and tests).

    Weights are bf16 (MXU operands) with f32 accumulation; hidden bias-add and
    sigmoid run in b1.dtype (bf16 on v6e/v7x, f32 on v5e); logits/softmax are
    f32.  Padded action columns of b4 hold -1e30, so exp underflows to exactly
    0 and the softmax covers only the real actions.
    """
    cdt = w1.dtype          # matmul operand dtype (bf16)
    adt = b1.dtype          # hidden-activation dtype (bf16 or f32)

    h = _sigmoid(jnp.dot(x, w1, preferred_element_type=jnp.float32)
                 .astype(adt) + b1)
    h = _sigmoid(jnp.dot(h.astype(cdt), w2, preferred_element_type=jnp.float32)
                 .astype(adt) + b2)
    h = _sigmoid(jnp.dot(h.astype(cdt), w3, preferred_element_type=jnp.float32)
                 .astype(adt) + b3)

    logits = jnp.dot(h.astype(cdt), w4,
                     preferred_element_type=jnp.float32) + b4   # f32, masked

    m = jnp.max(logits, axis=-1, keepdims=True)
    e = jnp.exp(logits - m)
    denom = jnp.sum(e, axis=-1, keepdims=True)
    return e * (1.0 / denom)                                    # exact norm


def actor_kernel(x_ref, w1_ref, b1_ref, w2_ref, b2_ref, w3_ref, b3_ref,
                 w4_ref, b4_ref, out_ref):
    out_ref[...] = _actor_math(
        x_ref[...], w1_ref[...], b1_ref[...], w2_ref[...], b2_ref[...],
        w3_ref[...], b3_ref[...], w4_ref[...], b4_ref[...])


def make_actor_params(key, input_dims, n_actions, dtype=jnp.float32):
    """PyTorch-nn.Linear-like uniform init; weights stored as (in, out)."""
    dims = [input_dims, 100, 200, 100, n_actions]
    params = []
    for i in range(4):
        key, kw, kb = jax.random.split(key, 3)
        bound = float(dims[i]) ** -0.5
        w = jax.random.uniform(kw, (dims[i], dims[i + 1]), dtype, -bound, bound)
        b = jax.random.uniform(kb, (dims[i + 1],), dtype, -bound, bound)
        params.append((w, b))
    return params


def pad_actor_params(params, compute_dtype=jnp.bfloat16, act_dtype=None):
    """One-time padding to (8,128)-friendly sizes.

    Weights -> compute_dtype (bf16 MXU operands).  Hidden biases -> act_dtype
    (bf16 on v6e/v7x, f32 on v5e).  Final bias stays f32 with -1e30 in the
    padded action columns (softmax mask baked in; padded weights are zero).
    """
    if act_dtype is None:
        act_dtype = _default_act_dtype()
    n_layers = len(params)
    dims = [params[0][0].shape[0]] + [w.shape[1] for w, _ in params]
    pdims = [_round_up(d, 128) for d in dims]
    padded = []
    for i, (w, b) in enumerate(params):
        w_p = (jnp.zeros((pdims[i], pdims[i + 1]), compute_dtype)
               .at[:dims[i], :dims[i + 1]].set(w.astype(compute_dtype)))
        last = (i == n_layers - 1)
        b_dt = jnp.float32 if last else act_dtype
        fill = -1e30 if last else 0.0
        b_p = (jnp.full((1, pdims[i + 1]), fill, b_dt)
               .at[0, :dims[i + 1]].set(b.astype(b_dt)))
        padded.extend([w_p, b_p])
    return tuple(padded)


def _choose_batch_tiling(B, batch_tile):
    """Balanced row tiles; even step count so v7x can use both TensorCores."""
    num_tiles = _cdiv(B, batch_tile)
    if num_tiles == 1 and B >= 256:
        num_tiles = 2                      # give the 2nd TC work on v7x
    if num_tiles > 1 and (num_tiles % 2):
        num_tiles += 1                     # even steps -> balanced 2-TC split
    tb = _round_up(_cdiv(B, num_tiles), 8)
    return tb, tb * num_tiles, num_tiles


@functools.partial(jax.jit,
                   static_argnames=("n_actions", "batch_tile",
                                    "small_batch_fallback"))
def actor_forward(state, padded_params, n_actions, batch_tile=1024,
                  small_batch_fallback=True):
    """Pad the batch, run the fused kernel over a row grid, slice the result."""
    B, input_dims = state.shape
    w1, b1, w2, b2, w3, b3, w4, b4 = padded_params
    cdt = w1.dtype
    p_in, p_h1 = w1.shape
    p_h2 = w2.shape[1]
    p_h3 = w3.shape[1]
    p_out = w4.shape[1]

    # Tiny batches: launch overhead dominates -> plain fused XLA path with the
    # exact same math and dtypes.
    if small_batch_fallback and B <= 64:
        x = (jnp.zeros((B, p_in), cdt)
             .at[:, :input_dims].set(state.astype(cdt)))
        probs = _actor_math(x, *padded_params)
        return probs[:B, :n_actions]

    tb, B_pad, num_tiles = _choose_batch_tiling(B, batch_tile)

    # Pad + cast the input once in the wrapper (bf16 -> half the input DMA,
    # no per-tile pack inside the kernel).
    x_p = (jnp.zeros((B_pad, p_in), cdt)
           .at[:B, :input_dims].set(state.astype(cdt)))

    # Row-tiled activations; weights/biases use constant index maps so they are
    # DMA'd once and stay resident in VMEM for the whole batch grid.
    x_spec = pl.BlockSpec((tb, p_in), lambda i: (i, 0))
    param_specs = [pl.BlockSpec(p.shape, lambda i: (0, 0)) for p in padded_params]
    out_spec = pl.BlockSpec((tb, p_out), lambda i: (i, 0))

    param_bytes = sum(int(p.size) * p.dtype.itemsize for p in padded_params)
    x_bytes = B_pad * p_in * jnp.dtype(cdt).itemsize
    cost = pl.CostEstimate(
        flops=2 * B_pad * (p_in * p_h1 + p_h1 * p_h2 + p_h2 * p_h3 + p_h3 * p_out),
        transcendentals=B_pad * (p_h1 + p_h2 + p_h3 + p_out),
        bytes_accessed=param_bytes + x_bytes + 4 * B_pad * p_out)

    out_padded = pl.pallas_call(
        actor_kernel,
        out_shape=jax.ShapeDtypeStruct((B_pad, p_out), jnp.float32),
        grid=(num_tiles,),
        in_specs=[x_spec] + param_specs,
        out_specs=out_spec,
        compiler_params=pltpu.CompilerParams(
            dimension_semantics=("parallel",)),   # v7x: shard rows over 2 TCs
        cost_estimate=cost,
    )(x_p, *padded_params)

    return out_padded[:B, :n_actions]


def actor_forward_ref(state, params):
    """Pure-JAX f32 reference for correctness checking."""
    h = state
    for i, (w, b) in enumerate(params):
        h = h @ w + b
        if i < len(params) - 1:
            h = jax.nn.sigmoid(h)
    return jax.nn.softmax(h, axis=-1)


if __name__ == "__main__":
    key = jax.random.PRNGKey(0)
    key, k_state, k_params = jax.random.split(key, 3)

    batch = 2
    input_dims = 16   # small observation vector
    n_actions = 4

    state = jax.random.normal(k_state, (batch, input_dims), jnp.float32)
    params = make_actor_params(k_params, input_dims, n_actions)
    padded_params = pad_actor_params(params)          # one-time padding/cast

    # Force the Pallas kernel path at the small shape.
    probs = jax.block_until_ready(
        actor_forward(state, padded_params, n_actions,
                      small_batch_fallback=False))
    # Dense XLA fallback path (same math/dtypes) — doubles as a matched reference.
    probs_matched = jax.block_until_ready(
        actor_forward(state, padded_params, n_actions))
    probs_ref = actor_forward_ref(state, params)

    assert probs.shape == (batch, n_actions)
    assert jnp.allclose(jnp.sum(probs, axis=-1), 1.0, atol=1e-3)
    assert jnp.allclose(probs, probs_matched, atol=1e-2, rtol=1e-2)
    # bf16 matmul operands (+ bf16 activations on v6e/v7x) vs f32 reference.
    assert jnp.allclose(probs, probs_ref, atol=5e-2, rtol=5e-2)

    # Larger batch: balanced even grid (B=300 -> 2 tiles of 152 rows).
    key, k_big = jax.random.split(key)
    big_state = jax.random.normal(k_big, (300, input_dims), jnp.float32)
    big_probs = jax.block_until_ready(
        actor_forward(big_state, padded_params, n_actions))
    big_ref = actor_forward_ref(big_state, params)
    assert big_probs.shape == (300, n_actions)
    assert jnp.allclose(jnp.sum(big_probs, axis=-1), 1.0, atol=1e-3)
    assert jnp.allclose(big_probs, big_ref, atol=5e-2, rtol=5e-2)

    # Exercise a multi-step grid explicitly (4 tiles of 80 rows); weights stay
    # resident in VMEM across the grid.  Result must match the 2-tile run.
    big_probs2 = jax.block_until_ready(
        actor_forward(big_state, padded_params, n_actions, batch_tile=128))
    assert jnp.allclose(big_probs2, big_probs, atol=1e-2, rtol=1e-2)

    # TODO(synk): torch.distributions.Categorical wrapper has no Pallas
    # equivalent; the kernel returns the probability vector that parameterizes it.
    print("KERNEL_OK")
</pallas_src>

<mosaic_0001>
module attributes {stable_mosaic.version = 11 : i64} {
  func.func @actor_kernel(%arg0: i32, %arg1: memref<8x128xbf16, #tpu.memory_space<vmem>>, %arg2: memref<128x128xbf16, #tpu.memory_space<vmem>>, %arg3: memref<1x128xf32, #tpu.memory_space<vmem>>, %arg4: memref<128x256xbf16, #tpu.memory_space<vmem>>, %arg5: memref<1x256xf32, #tpu.memory_space<vmem>>, %arg6: memref<256x128xbf16, #tpu.memory_space<vmem>>, %arg7: memref<1x128xf32, #tpu.memory_space<vmem>>, %arg8: memref<128x128xbf16, #tpu.memory_space<vmem>>, %arg9: memref<1x128xf32, #tpu.memory_space<vmem>>, %arg10: memref<8x128xf32, #tpu.memory_space<vmem>>) attributes {dimension_semantics = [#tpu.dimension_semantics<parallel>], iteration_bounds = array<i64: 1>, scalar_prefetch = 0 : i64, scratch_operands = 0 : i64, tpu.core_type = #tpu.core_type<tc>, window_params = [{transform_indices = @transform_0, window_bounds = array<i64: 8, 128>}, {pipeline_mode = #tpu.pipeline_mode<synchronous>, transform_indices = @transform_1, window_bounds = array<i64: 128, 128>}, {pipeline_mode = #tpu.pipeline_mode<synchronous>, transform_indices = @transform_2, window_bounds = array<i64: 1, 128>}, {pipeline_mode = #tpu.pipeline_mode<synchronous>, transform_indices = @transform_3, window_bounds = array<i64: 128, 256>}, {pipeline_mode = #tpu.pipeline_mode<synchronous>, transform_indices = @transform_4, window_bounds = array<i64: 1, 256>}, {pipeline_mode = #tpu.pipeline_mode<synchronous>, transform_indices = @transform_5, window_bounds = array<i64: 256, 128>}, {pipeline_mode = #tpu.pipeline_mode<synchronous>, transform_indices = @transform_6, window_bounds = array<i64: 1, 128>}, {pipeline_mode = #tpu.pipeline_mode<synchronous>, transform_indices = @transform_7, window_bounds = array<i64: 128, 128>}, {pipeline_mode = #tpu.pipeline_mode<synchronous>, transform_indices = @transform_8, window_bounds = array<i64: 1, 128>}, {transform_indices = @transform_9, window_bounds = array<i64: 8, 128>}]} {
    %c0 = arith.constant 0 : index
    %c0_0 = arith.constant 0 : index
    %0 = vector.load %arg1[%c0, %c0_0] : memref<8x128xbf16, #tpu.memory_space<vmem>>, vector<8x128xbf16>
    %c0_1 = arith.constant 0 : index
    %c0_2 = arith.constant 0 : index
    %1 = vector.load %arg2[%c0_1, %c0_2] : memref<128x128xbf16, #tpu.memory_space<vmem>>, vector<128x128xbf16>
    %c0_3 = arith.constant 0 : index
    %c0_4 = arith.constant 0 : index
    %2 = vector.load %arg3[%c0_3, %c0_4] : memref<1x128xf32, #tpu.memory_space<vmem>>, vector<1x128xf32>
    %c0_5 = arith.constant 0 : index
    %c0_6 = arith.constant 0 : index
    %3 = vector.load %arg4[%c0_5, %c0_6] : memref<128x256xbf16, #tpu.memory_space<vmem>>, vector<128x256xbf16>
    %c0_7 = arith.constant 0 : index
    %c0_8 = arith.constant 0 : index
    %4 = vector.load %arg5[%c0_7, %c0_8] : memref<1x256xf32, #tpu.memory_space<vmem>>, vector<1x256xf32>
    %c0_9 = arith.constant 0 : index
    %c0_10 = arith.constant 0 : index
    %5 = vector.load %arg6[%c0_9, %c0_10] : memref<256x128xbf16, #tpu.memory_space<vmem>>, vector<256x128xbf16>
    %c0_11 = arith.constant 0 : index
    %c0_12 = arith.constant 0 : index
    %6 = vector.load %arg7[%c0_11, %c0_12] : memref<1x128xf32, #tpu.memory_space<vmem>>, vector<1x128xf32>
    %c0_13 = arith.constant 0 : index
    %c0_14 = arith.constant 0 : index
    %7 = vector.load %arg8[%c0_13, %c0_14] : memref<128x128xbf16, #tpu.memory_space<vmem>>, vector<128x128xbf16>
    %c0_15 = arith.constant 0 : index
    %c0_16 = arith.constant 0 : index
    %8 = vector.load %arg9[%c0_15, %c0_16] : memref<1x128xf32, #tpu.memory_space<vmem>>, vector<1x128xf32>
    %cst = arith.constant dense<0.000000e+00> : vector<8x128xf32>
    %9 = tpu.matmul %0, %1, %cst {dimension_numbers = #tpu.dot_dimension_numbers<[1], [0], [0], [1], [0, 0, 1, 1], [], []>} : vector<8x128xbf16>, vector<128x128xbf16>, vector<8x128xf32> -> vector<8x128xf32>
    %10 = vector.broadcast %2 : vector<1x128xf32> to vector<8x128xf32>
    %11 = arith.addf %9, %10 : vector<8x128xf32>
    %cst_17 = arith.constant 5.000000e-01 : f32
    %12 = vector.broadcast %cst_17 : f32 to vector<8x128xf32>
    %13 = arith.mulf %12, %11 : vector<8x128xf32>
    %14 = math.tanh %13 : vector<8x128xf32>
    %cst_18 = arith.constant 5.000000e-01 : f32
    %15 = vector.broadcast %cst_18 : f32 to vector<8x128xf32>
    %16 = arith.mulf %15, %14 : vector<8x128xf32>
    %cst_19 = arith.constant 5.000000e-01 : f32
    %17 = vector.broadcast %cst_19 : f32 to vector<8x128xf32>
    %18 = arith.addf %16, %17 : vector<8x128xf32>
    %19 = arith.truncf %18 : vector<8x128xf32> to vector<8x128xbf16>
    %cst_20 = arith.constant dense<0.000000e+00> : vector<8x256xf32>
    %20 = tpu.matmul %19, %3, %cst_20 {dimension_numbers = #tpu.dot_dimension_numbers<[1], [0], [0], [1], [0, 0, 1, 1], [], []>} : vector<8x128xbf16>, vector<128x256xbf16>, vector<8x256xf32> -> vector<8x256xf32>
    %21 = vector.broadcast %4 : vector<1x256xf32> to vector<8x256xf32>
    %22 = arith.addf %20, %21 : vector<8x256xf32>
    %cst_21 = arith.constant 5.000000e-01 : f32
    %23 = vector.broadcast %cst_21 : f32 to vector<8x256xf32>
    %24 = arith.mulf %23, %22 : vector<8x256xf32>
    %25 = math.tanh %24 : vector<8x256xf32>
    %cst_22 = arith.constant 5.000000e-01 : f32
    %26 = vector.broadcast %cst_22 : f32 to vector<8x256xf32>
    %27 = arith.mulf %26, %25 : vector<8x256xf32>
    %cst_23 = arith.constant 5.000000e-01 : f32
    %28 = vector.broadcast %cst_23 : f32 to vector<8x256xf32>
    %29 = arith.addf %27, %28 : vector<8x256xf32>
    %30 = arith.truncf %29 : vector<8x256xf32> to vector<8x256xbf16>
    %cst_24 = arith.constant dense<0.000000e+00> : vector<8x128xf32>
    %31 = tpu.matmul %30, %5, %cst_24 {dimension_numbers = #tpu.dot_dimension_numbers<[1], [0], [0], [1], [0, 0, 1, 1], [], []>} : vector<8x256xbf16>, vector<256x128xbf16>, vector<8x128xf32> -> vector<8x128xf32>
    %32 = vector.broadcast %6 : vector<1x128xf32> to vector<8x128xf32>
    %33 = arith.addf %31, %32 : vector<8x128xf32>
    %cst_25 = arith.constant 5.000000e-01 : f32
    %34 = vector.broadcast %cst_25 : f32 to vector<8x128xf32>
    %35 = arith.mulf %34, %33 : vector<8x128xf32>
    %36 = math.tanh %35 : vector<8x128xf32>
    %cst_26 = arith.constant 5.000000e-01 : f32
    %37 = vector.broadcast %cst_26 : f32 to vector<8x128xf32>
    %38 = arith.mulf %37, %36 : vector<8x128xf32>
    %cst_27 = arith.constant 5.000000e-01 : f32
    %39 = vector.broadcast %cst_27 : f32 to vector<8x128xf32>
    %40 = arith.addf %38, %39 : vector<8x128xf32>
    %41 = arith.truncf %40 : vector<8x128xf32> to vector<8x128xbf16>
    %cst_28 = arith.constant dense<0.000000e+00> : vector<8x128xf32>
    %42 = tpu.matmul %41, %7, %cst_28 {dimension_numbers = #tpu.dot_dimension_numbers<[1], [0], [0], [1], [0, 0, 1, 1], [], []>} : vector<8x128xbf16>, vector<128x128xbf16>, vector<8x128xf32> -> vector<8x128xf32>
    %43 = vector.broadcast %8 : vector<1x128xf32> to vector<8x128xf32>
    %44 = arith.addf %42, %43 : vector<8x128xf32>
    %cst_29 = arith.constant dense<0xFF800000> : vector<8xf32>
    %45 = vector.multi_reduction <maximumf>, %44, %cst_29 [1] : vector<8x128xf32> to vector<8xf32>
    %46 = vector.shape_cast %45 : vector<8xf32> to vector<8x1xf32>
    %47 = vector.broadcast %46 : vector<8x1xf32> to vector<8x128xf32>
    %48 = arith.subf %44, %47 : vector<8x128xf32>
    %49 = math.exp %48 : vector<8x128xf32>
    %cst_30 = arith.constant dense<0.000000e+00> : vector<8xf32>
    %50 = vector.multi_reduction <add>, %49, %cst_30 [1] : vector<8x128xf32> to vector<8xf32>
    %51 = vector.shape_cast %50 : vector<8xf32> to vector<8x1xf32>
    %cst_31 = arith.constant 1.000000e+00 : f32
    %52 = vector.broadcast %cst_31 : f32 to vector<8x1xf32>
    %53 = arith.divf %52, %51 : vector<8x1xf32>
    %54 = vector.broadcast %53 : vector<8x1xf32> to vector<8x128xf32>
    %55 = arith.mulf %49, %54 : vector<8x128xf32>
    %c0_32 = arith.constant 0 : index
    %c0_33 = arith.constant 0 : index
    %56 = vector.load %arg10[%c0_32, %c0_33] : memref<8x128xf32, #tpu.memory_space<vmem>>, vector<8x128xf32>
    tpu.vector_store %arg10[%c0_32, %c0_33], %55 {strides = array<i32>} : memref<8x128xf32, #tpu.memory_space<vmem>>, vector<8x128xf32>,
    return
  }
  func.func @transform_0(%arg0: i32) -> (i32, i32) {
    %c0_i32 = arith.constant 0 : i32
    %c0_i32_0 = arith.constant 0 : i32
    return %arg0, %c0_i32 : i32, i32
  }
  func.func @transform_1(%arg0: i32) -> (i32, i32) {
    %c0_i32 = arith.constant 0 : i32
    %c0_i32_0 = arith.constant 0 : i32
    %c0_i32_1 = arith.constant 0 : i32
    return %c0_i32, %c0_i32_0 : i32, i32
  }
  func.func @transform_2(%arg0: i32) -> (i32, i32) {
    %c0_i32 = arith.constant 0 : i32
    %c0_i32_0 = arith.constant 0 : i32
    %c0_i32_1 = arith.constant 0 : i32
    return %c0_i32, %c0_i32_0 : i32, i32
  }
  func.func @transform_3(%arg0: i32) -> (i32, i32) {
    %c0_i32 = arith.constant 0 : i32
    %c0_i32_0 = arith.constant 0 : i32
    %c0_i32_1 = arith.constant 0 : i32
    return %c0_i32, %c0_i32_0 : i32, i32
  }
  func.func @transform_4(%arg0: i32) -> (i32, i32) {
    %c0_i32 = arith.constant 0 : i32
    %c0_i32_0 = arith.constant 0 : i32
    %c0_i32_1 = arith.constant 0 : i32
    return %c0_i32, %c0_i32_0 : i32, i32
  }
  func.func @transform_5(%arg0: i32) -> (i32, i32) {
    %c0_i32 = arith.constant 0 : i32
    %c0_i32_0 = arith.constant 0 : i32
    %c0_i32_1 = arith.constant 0 : i32
    return %c0_i32, %c0_i32_0 : i32, i32
  }
  func.func @transform_6(%arg0: i32) -> (i32, i32) {
    %c0_i32 = arith.constant 0 : i32
    %c0_i32_0 = arith.constant 0 : i32
    %c0_i32_1 = arith.constant 0 : i32
    return %c0_i32, %c0_i32_0 : i32, i32
  }
  func.func @transform_7(%arg0: i32) -> (i32, i32) {
    %c0_i32 = arith.constant 0 : i32
    %c0_i32_0 = arith.constant 0 : i32
    %c0_i32_1 = arith.constant 0 : i32
    return %c0_i32, %c0_i32_0 : i32, i32
  }
  func.func @transform_8(%arg0: i32) -> (i32, i32) {
    %c0_i32 = arith.constant 0 : i32
    %c0_i32_0 = arith.constant 0 : i32
    %c0_i32_1 = arith.constant 0 : i32
    return %c0_i32, %c0_i32_0 : i32, i32
  }
  func.func @transform_9(%arg0: i32) -> (i32, i32) {
    %c0_i32 = arith.constant 0 : i32
    %c0_i32_0 = arith.constant 0 : i32
    return %arg0, %c0_i32 : i32, i32
  }
}

</mosaic_0001>

<bundles_post_ra>
// kernel: actor_forward.1
= control target key start
LH: loop header
LB: loop body
LE: loop exit
PB: predicated region body
PF: predicated region fallthrough
CT: control target
= control target key end

     0   :  { %14 = vsyncpa [#allocation3], 0  ;;  %s1048_s0 = inlined_call_operand.vmem [shape: bf16[8,128], index: 0, kind: input, shape index: {}]   ;;  %s1049_s1 = inlined_call_operand.hbm [shape: bf16[128,128], index: 1, kind: input, shape index: {}]   ;;  %s1050_s2 = inlined_call_operand.vmem [shape: f32[1,128], index: 2, kind: input, shape index: {}]   ;;  %s1051_s3 = inlined_call_operand.hbm [shape: bf16[128,256], index: 3, kind: input, shape index: {}]   ;;  %s1052_s4 = inlined_call_operand.vmem [shape: f32[1,256], index: 4, kind: input, shape index: {}]   ;;  %s1053_s5 = inlined_call_operand.hbm [shape: bf16[256,128], index: 5, kind: input, shape index: {}]   ;;  %s1054_s6 = inlined_call_operand.vmem [shape: f32[1,128], index: 6, kind: input, shape index: {}]   ;;  %s1055_s7 = inlined_call_operand.hbm [shape: bf16[128,128], index: 7, kind: input, shape index: {}]   ;;  %s1056_s8 = inlined_call_operand.vmem [shape: f32[1,128], index: 8, kind: input, shape index: {}]   ;;  %s1057_s9 = inlined_call_operand.vmem [shape: f32[8,128], index: 9, kind: output, shape index: {}]  }
   0x1   :  { %15 = vsyncpa [#allocation5], 0  ;;  %s38_s11 = sshll.u32 %s1051_s3, 4  ;;  %s39_s11 = int_to_ptr.hbm [resolvable:$true] %s38_s11 }
   0x2   :  { %16 = vsyncpa [#allocation8], 0  ;;  %s960_s12 = smov [#allocation4]   ;;  %s23_s16 = sshll.u32 %s1049_s1, 4  ;;  %s24_s16 = int_to_ptr.hbm [resolvable:$true] %s23_s16 }
   0x3   :  { %s40_s13 = sshll.u32 %s960_s12, 4  ;;  %s961_s17 = smov 128   ;;  %s41_s13 = int_to_ptr.vmem [resolvable:$true] %s40_s13 }
   0x4   :  { %s962_s18 = smov 8   ;;  %s963_s19 = smov [#allocation2]  }
   0x5   :  { %46 = dma.hbm_to_vmem [thread:$0]  %s39_s11, 2048, %s41_s13, [#allocation5], %s961_s17, %s961_s17, %s962_s18  }
   0x6   :  { %s25_s20 = sshll.u32 %s963_s19, 4  ;;  %s964_s21 = smov 64   ;;  %s26_s20 = int_to_ptr.vmem [resolvable:$true] %s25_s20 }
   0x7   :  { %s965_s22 = smov 4   ;;  %s53_s24 = sshll.u32 %s1053_s5, 4  ;;  %s54_s24 = int_to_ptr.hbm [resolvable:$true] %s53_s24 }
   0x8   :  { %31 = dma.hbm_to_vmem [thread:$0]  %s24_s16, 1024, %s26_s20, [#allocation3], %s964_s21, %s964_s21, %s965_s22  }
   0x9   :  { %s966_s25 = smov [#allocation6]   ;;  %s68_s28 = sshll.u32 %s1055_s7, 4  ;;  %s69_s28 = int_to_ptr.hbm [resolvable:$true] %s68_s28 }
   0xa   :  { %s55_s26 = sshll.u32 %s966_s25, 4  ;;  %s967_s29 = smov [#allocation7]   ;;  %s56_s26 = int_to_ptr.vmem [resolvable:$true] %s55_s26 }
   0xb   :  { %61 = dma.hbm_to_vmem [thread:$0]  %s54_s24, 2048, %s56_s26, [#allocation5], %s964_s21, %s964_s21, %s965_s22  }
   0xc   :  { %s70_s30 = sshll.u32 %s967_s29, 4  ;;  %s71_s30 = int_to_ptr.vmem [resolvable:$true] %s70_s30 }
   0xd   :  { %76 = dma.hbm_to_vmem [thread:$0]  %s69_s28, 1024, %s71_s30, [#allocation8], %s964_s21, %s964_s21, %s965_s22  }
   0xe   :  { %954 = dma.done.wait [#allocation3], 1024  }
   0xf   :  { %955 = vsyncadd [#allocation3], 4294966272 }
  0x10   :  { %956 = dma.done.wait [#allocation5], 4096  }
  0x11   :  { %957 = vsyncadd [#allocation5], 4294963200 }
  0x12   :  { %958 = dma.done.wait [#allocation8], 1024  }
  0x13   :  { %959 = vsyncadd [#allocation8], 4294966272  ;;  %v794_v0 = vld [vmem:[#allocation2 + $0x38] sm:$0xff]  ;;  %v793_v1 = vld [vmem:[#allocation2 + $0x30] sm:$0xff] }
  0x14   :  { %231 = vmatpush.bf16.msra.mxu0 %v794_v0  ;;  %v685_v2 = vld [vmem:[#allocation4 + $0x70] sm:$0xf]  ;;  %v810_v3 = vld [vmem:[#allocation4 + $0x74] sm:$0xf0]  ;;  %v809_v4 = vld [vmem:[#allocation4 + $0x74] sm:$0xf] }
  0x15   :  { %v686_v5 = vor.u32 %v810_v3, %v685_v2  ;;  %v687_v6 = vld [vmem:[#allocation4 + $0x78] sm:$0xf0]  ;;  %v677_v7 = vld [vmem:[#allocation4 + $0x60] sm:$0xf]  ;;  %v808_v8 = vld [vmem:[#allocation4 + $0x64] sm:$0xf0] }
  0x16   :  { %v690_v9 = vor.u32 %v809_v4, %v687_v6  ;;  %v807_v10 = vld [vmem:[#allocation4 + $0x64] sm:$0xf]  ;;  %v679_v11 = vld [vmem:[#allocation4 + $0x68] sm:$0xf0]  ;;  %v678_v13 = vor.u32 %v808_v8, %v677_v7  ;;  %v669_v15 = vld [vmem:[#allocation4 + $0x50] sm:$0xf] }
  0x17   :  { %v792_v12 = vld [vmem:[#allocation2 + $0x28] sm:$0xff]  ;;  %334 = vmatpush.bf16.msra.mxu1 %v686_v5  ;;  %v682_v14 = vor.u32 %v807_v10, %v679_v11  ;;  %v806_v16 = vld [vmem:[#allocation4 + $0x54] sm:$0xf0]  ;;  %v805_v17 = vld [vmem:[#allocation4 + $0x54] sm:$0xf] }
  0x18   :  { %232 = vmatpush.bf16.msra.mxu0 %v793_v1  ;;  %347 = vmatpush.bf16.msra.mxu2 %v690_v9  ;;  %v671_v18 = vld [vmem:[#allocation4 + $0x58] sm:$0xf0]  ;;  %v791_v19 = vld [vmem:[#allocation2 + $0x20] sm:$0xff]  ;;  %v670_v20 = vor.u32 %v806_v16, %v669_v15  ;;  %v804_v23 = vld [vmem:[#allocation4 + $0x44] sm:$0xf0] }
  0x19   :  { %v674_v21 = vor.u32 %v805_v17, %v671_v18  ;;  %v661_v22 = vld [vmem:[#allocation4 + $0x40] sm:$0xf]  ;;  %v803_v24 = vld [vmem:[#allocation4 + $0x44] sm:$0xf]  ;;  %v663_v25 = vld [vmem:[#allocation4 + $0x48] sm:$0xf0] }
  0x1a   :  { %v790_v26 = vld [vmem:[#allocation2 + $0x18] sm:$0xff]  ;;  %v662_v27 = vor.u32 %v804_v23, %v661_v22  ;;  %v666_v28 = vor.u32 %v803_v24, %v663_v25  ;;  %v789_v29 = vld [vmem:[#allocation2 + $0x10] sm:$0xff]  ;;  %v788_v30 = vld [vmem:[#allocation2 + $0x8] sm:$0xff] }
  0x1b   :  { %335 = vmatpush.bf16.msra.mxu1 %v678_v13  ;;  %v787_v31 = vld [vmem:[#allocation2] sm:$0xff]  ;;  %v653_v33 = vld [vmem:[#allocation4 + $0x30] sm:$0xf]  ;;  %v802_v34 = vld [vmem:[#allocation4 + $0x34] sm:$0xf0] }
  0x1c   :  { %233 = vmatpush.bf16.msra.mxu0 %v792_v12  ;;  %348 = vmatpush.bf16.msra.mxu2 %v682_v14  ;;  %v95_v32 = vld [vmem:[%s1048_s0] sm:$0xf]  ;;  %v801_v35 = vld [vmem:[#allocation4 + $0x34] sm:$0xf]  ;;  %v654_v36 = vor.u32 %v802_v34, %v653_v33  ;;  %v655_v37 = vld [vmem:[#allocation4 + $0x38] sm:$0xf0] }
  0x1d   :  { %v658_v38 = vor.u32 %v801_v35, %v655_v37  ;;  %v645_v39 = vld [vmem:[#allocation4 + $0x20] sm:$0xf]  ;;  %v800_v40 = vld [vmem:[#allocation4 + $0x24] sm:$0xf0]  ;;  %v799_v41 = vld [vmem:[#allocation4 + $0x24] sm:$0xf] }
  0x1e   :  { %v646_v42 = vor.u32 %v800_v40, %v645_v39  ;;  %v647_v43 = vld [vmem:[#allocation4 + $0x28] sm:$0xf0]  ;;  %v637_v45 = vld [vmem:[#allocation4 + $0x10] sm:$0xf]  ;;  %v798_v46 = vld [vmem:[#allocation4 + $0x14] sm:$0xf0] }
  0x1f   :  { %336 = vmatpush.bf16.msra.mxu1 %v670_v20  ;;  %v650_v44 = vor.u32 %v799_v41, %v647_v43  ;;  %v797_v47 = vld [vmem:[#allocation4 + $0x14] sm:$0xf]  ;;  %v638_v48 = vor.u32 %v798_v46, %v637_v45  ;;  %v639_v49 = vld [vmem:[#allocation4 + $0x18] sm:$0xf0]  ;;  %v629_v50 = vld [vmem:[#allocation4] sm:$0xf] }
  0x20   :  { %234 = vmatpush.bf16.msra.mxu0 %v791_v19  ;;  %349 = vmatpush.bf16.msra.mxu2 %v674_v21  ;;  %v796_v51 = vld [vmem:[#allocation4 + $0x4] sm:$0xf0]  ;;  %v642_v52 = vor.u32 %v797_v47, %v639_v49  ;;  %v795_v53 = vld [vmem:[#allocation4 + $0x4] sm:$0xf]  ;;  %v631_v54 = vld [vmem:[#allocation4 + $0x8] sm:$0xf0] }
  0x21   :  { %v630_v55 = vor.u32 %v796_v51, %v629_v50  ;;  %v634_v56 = vor.u32 %v795_v53, %v631_v54  ;;  %v818_v57 = vld [vmem:[#allocation6 + $0x38] sm:$0xff]  ;;  %v817_v59 = vld [vmem:[#allocation6 + $0x30] sm:$0xff]  ;;  %v816_v61 = vld [vmem:[#allocation6 + $0x28] sm:$0xff] }
  0x22   :  { %v826_v58 = vld [vmem:[#allocation6 + $0x78] sm:$0xff]  ;;  %469 = vmatpush.bf16.msra.mxu3 %v818_v57  ;;  %v825_v60 = vld [vmem:[#allocation6 + $0x70] sm:$0xff]  ;;  %v815_v62 = vld [vmem:[#allocation6 + $0x20] sm:$0xff] }
  0x23   :  { %337 = vmatpush.bf16.msra.mxu1 %v662_v27  ;;  %v843_v63 = vld [vmem:[%s1050_s2] ss:$0 sm:$0xff]  ;;  %v824_v8 = vld [vmem:[#allocation6 + $0x68] sm:$0xff]  ;;  %v814_v9 = vld [vmem:[#allocation6 + $0x18] sm:$0xff] }
  0x24   :  { %235 = vmatpush.bf16.msra.mxu0 %v790_v26  ;;  %350 = vmatpush.bf16.msra.mxu2 %v666_v28  ;;  %v823_v10 = vld [vmem:[#allocation6 + $0x60] sm:$0xff]  ;;  %v813_v11 = vld [vmem:[#allocation6 + $0x10] sm:$0xff]  ;;  %v822_v12 = vld [vmem:[#allocation6 + $0x58] sm:$0xff] }
  0x25   :  { %v812_v13 = vld [vmem:[#allocation6 + $0x8] sm:$0xff]  ;;  %v821_v14 = vld [vmem:[#allocation6 + $0x50] sm:$0xff]  ;;  %v811_v15 = vld [vmem:[#allocation6] sm:$0xff] }
  0x26   :  { %470 = vmatpush.bf16.msra.mxu3 %v817_v59  ;;  %v820_v16 = vld [vmem:[#allocation6 + $0x48] sm:$0xff]  ;;  %v819_v17 = vld [vmem:[#allocation6 + $0x40] sm:$0xff]  ;;  %v834_v18 = vld [vmem:[#allocation7 + $0x38] sm:$0xff] }
  0x27   :  { %338 = vmatpush.bf16.msra.mxu1 %v654_v36  ;;  %v129_v19 = vld [vmem:[%s1052_s4] sm:$0x3]  ;;  %v833_v20 = vld [vmem:[#allocation7 + $0x30] sm:$0xff]  ;;  %v832_v22 = vld [vmem:[#allocation7 + $0x28] sm:$0xff] }
  0x28   :  { %236 = vmatpush.bf16.msra.mxu0 %v789_v29  ;;  %351 = vmatpush.bf16.msra.mxu2 %v658_v38  ;;  %v250_v21 = vperm.slane %v129_v19, 0  ;;  %v251_v26 = vperm.slane %v129_v19, 1  ;;  %v831_v40 = vld [vmem:[#allocation7 + $0x20] sm:$0xff]  ;;  %v830_v41 = vld [vmem:[#allocation7 + $0x18] sm:$0xff]  ;;  %v828_v43 = vld [vmem:[#allocation7 + $0x8] sm:$0xff] }
  0x29   :  { %v844_v45 = vld [vmem:[%s1054_s6] ss:$0 sm:$0xff] }
  0x2a   :  { %471 = vmatpush.bf16.msra.mxu3 %v816_v61  ;;  %v845_v57 = vld [vmem:[%s1056_s8] ss:$0 sm:$0xff] }
  0x2b   :  { %339 = vmatpush.bf16.msra.mxu1 %v646_v42  ;;  %v829_v42 = vld [vmem:[#allocation7 + $0x10] sm:$0xff] }
  0x2c   :  { %237 = vmatpush.bf16.msra.mxu0 %v788_v30  ;;  %352 = vmatpush.bf16.msra.mxu2 %v650_v44  ;;  %v827_v44 = vld [vmem:[#allocation7] sm:$0xff] }
  0x2e   :  { %472 = vmatpush.bf16.msra.mxu3 %v815_v62 }
  0x2f   :  { %340 = vmatpush.bf16.msra.mxu1 %v638_v48 }
  0x30   :  { %238 = vmatpush.bf16.msra.mxu0 %v787_v31  ;;  %353 = vmatpush.bf16.msra.mxu2 %v642_v52 }
  0x32   :  { %473 = vmatpush.bf16.msra.mxu3 %v814_v9 }
  0x33   :  { %239 = vmatmul.bf16.vlgmr.msra.gmra.mxu0 %v95_v32  ;;  %341 = vmatpush.bf16.msra.mxu1 %v630_v55 }
  0x34   :  { %354 = vmatpush.bf16.msra.mxu2 %v634_v56  ;;  %482 = vmatpush.bf16.msrb.mxu0 %v826_v58 }
  0x36   :  { %474 = vmatpush.bf16.msra.mxu3 %v813_v11 }
  0x37   :  { %551 = vmatpush.bf16.msrb.mxu1 %v834_v18 }
  0x38   :  { %483 = vmatpush.bf16.msrb.mxu0 %v825_v60 }
  0x3a   :  { %475 = vmatpush.bf16.msra.mxu3 %v812_v13 }
  0x3b   :  { %552 = vmatpush.bf16.msrb.mxu1 %v833_v20 }
  0x3c   :  { %484 = vmatpush.bf16.msrb.mxu0 %v824_v8 }
  0x3e   :  { %476 = vmatpush.bf16.msra.mxu3 %v811_v15 }
  0x3f   :  { %553 = vmatpush.bf16.msrb.mxu1 %v832_v22 }
  0x40   :  { %485 = vmatpush.bf16.msrb.mxu0 %v823_v10 }
  0x43   :  { %554 = vmatpush.bf16.msrb.mxu1 %v831_v40 }
  0x44   :  { %486 = vmatpush.bf16.msrb.mxu0 %v822_v12 }
  0x47   :  { %555 = vmatpush.bf16.msrb.mxu1 %v830_v41 }
  0x48   :  { %487 = vmatpush.bf16.msrb.mxu0 %v821_v14 }
  0x4b   :  { %556 = vmatpush.bf16.msrb.mxu1 %v829_v42 }
  0x4c   :  { %488 = vmatpush.bf16.msrb.mxu0 %v820_v16 }
  0x4f   :  { %557 = vmatpush.bf16.msrb.mxu1 %v828_v43 }
  0x50   :  { %489 = vmatpush.bf16.msrb.mxu0 %v819_v17 }
  0x53   :  { %558 = vmatpush.bf16.msrb.mxu1 %v827_v44 }
  0xb0   :  { %v240_v0 = vpop.f32.mrf.mxu0 }
  0xb1   :  { %v241_v1 = vadd.f32 %v843_v63, %v240_v0 }
  0xb3   :  { %v244_v2 = vmul.f32 0.5, %v241_v1 }
  0xb5   :  { %846 = vtanh.f32 %v244_v2 }
  0xb8   :  { %v242_v3 = vpop.f32.mrf.mxu0 }
  0xbb   :  { %v847_v4 = vpop.eup %846 }
  0xbc   :  { %v246_v5 = vmul.f32 0.5, %v847_v4 }
  0xbe   :  { %v247_v6 = vadd.f32 0.5, %v246_v5 }
  0xc0   :  { %v248_v7 = vpack.c.bf16 %v247_v6, %v247_v6 }
  0xc2   :  { %342 = vmatmul.bf16.vlgmr.msra.gmra.mxu1 %v248_v7  ;;  %355 = vmatmul.bf16.vlgmr.msra.gmra.mxu2 %v248_v7 }
 0x13f   :  { %v343_v23 = vpop.f32.mrf.mxu1 }
 0x140   :  { %v344_v24 = vadd.f32 %v343_v23, %v250_v21 }
 0x142   :  { %v360_v25 = vmul.f32 0.5, %v344_v24 }
 0x144   :  { %848 = vtanh.f32 %v360_v25 }
 0x145   :  { %v356_v27 = vpop.f32.mrf.mxu2 }
 0x146   :  { %v357_v28 = vadd.f32 %v356_v27, %v251_v26 }
 0x147   :  { %v345_v29 = vpop.f32.mrf.mxu1 }
 0x148   :  { %v361_v30 = vmul.f32 0.5, %v357_v28 }
 0x14a   :  { %v849_v31 = vpop.eup %848  ;;  %850 = vtanh.f32 %v361_v30 }
 0x14b   :  { %v364_v32 = vmul.f32 0.5, %v849_v31 }
 0x14d   :  { %v358_v33 = vpop.f32.mrf.mxu2  ;;  %v366_v34 = vadd.f32 0.5, %v364_v32 }
 0x14f   :  { %v368_v35 = vpack.c.bf16 %v366_v34, %v366_v34 }
 0x150   :  { %v851_v36 = vpop.eup %850 }
 0x151   :  { %v365_v37 = vmul.f32 0.5, %v851_v36  ;;  %477 = vmatmul.bf16.vlgmr.msra.gmra.mxu3 %v368_v35 }
 0x153   :  { %v367_v38 = vadd.f32 0.5, %v365_v37 }
 0x155   :  { %v369_v39 = vpack.c.bf16 %v367_v38, %v367_v38 }
 0x157   :  { %490 = vmatmul.bf16.vlgmr.msrb.gmra.mxu0 %v369_v39 }
 0x1d4   :  { %v478_v46 = vpop.f32.mrf.mxu3  ;;  %v491_v47 = vpop.f32.mrf.mxu0 }
 0x1d5   :  { %v479_v48 = vadd.f32 %v844_v45, %v478_v46 }
 0x1d7   :  { %v492_v49 = vadd.f32 %v491_v47, %v479_v48 }
 0x1d9   :  { %v495_v50 = vmul.f32 0.5, %v492_v49 }
 0x1db   :  { %852 = vtanh.f32 %v495_v50 }
 0x1dc   :  { %v480_v51 = vpop.f32.mrf.mxu3  ;;  %v493_v52 = vpop.f32.mrf.mxu0 }
 0x1e1   :  { %v853_v53 = vpop.eup %852 }
 0x1e2   :  { %v497_v54 = vmul.f32 0.5, %v853_v53 }
 0x1e4   :  { %v498_v55 = vadd.f32 0.5, %v497_v54 }
 0x1e6   :  { %v499_v56 = vpack.c.bf16 %v498_v55, %v498_v55 }
 0x1e8   :  { %559 = vmatmul.bf16.vlgmr.msrb.gmra.mxu1 %v499_v56 }
 0x265   :  { %v560_v58 = vpop.f32.mrf.mxu1 }
 0x266   :  { %v561_v59 = vadd.f32 %v845_v57, %v560_v58 }
 0x268   :  { %564 = vmax.xlane.f32.xlu0 %v561_v59 }
 0x26d   :  { %v562_v60 = vpop.f32.mrf.mxu1 }
 0x2db   :  { %v565_v61 = vpop.xlane.xlu0 %564 }
 0x2dc   :  { %v566_v62 = vsub.f32 %v561_v59, %v565_v61 }
 0x2de   :  { %v567_v63 = vmul.f32 1.442695, %v566_v62 }
 0x2e0   :  { %854 = vpow2.f32 %v567_v63 }
 0x2e6   :  { %v855_v0 = vpop.eup %854 }
 0x2e7   :  { %569 = vadd.xlane.f32.xlu0 %v855_v0 }
 0x35a   :  { %v570_v1 = vpop.xlane.xlu0 %569 }
 0x35b   :  { %856 = vrcp.f32 %v570_v1  ;;  %v582_v5 = vand.u32 2147483648, %v570_v1  ;;  %v580_v7 = vand.u32 2147483647, %v570_v1  ;;  %vm576_vm1 = vweird.f32 %v570_v1 }
 0x35d   :  { %v583_v9 = vor.u32 1.1754944e-38, %v582_v5  ;;  %vm581_vm3 = vcmp.eq.f32.partialorder %v580_v7, 8.507059e+37 }
 0x361   :  { %v857_v2 = vpop.eup %856 }
 0x362   :  { %v572_v3 = vmul.f32 %v857_v2, %v570_v1  ;;  %vm577_vm0 = vweird.f32 %v857_v2 }
 0x363   :  { %vm578_vm2 = vmor %vm576_vm1, %vm577_vm0 }
 0x364   :  { %v573_v4 = vsub.f32 1.0, %v572_v3 }
 0x366   :  { %v574_v6 = vmul.f32 %v857_v2, %v573_v4 }
 0x368   :  { %v575_v8 = vadd.f32 %v857_v2, %v574_v6 }
 0x36a   :  { %v579_v10 = vsel %vm578_vm2, %v857_v2, %v575_v8 }
 0x36b   :  { %v584_v11 = vsel %vm581_vm3, %v583_v9, %v579_v10 }
 0x36c   :  { %v586_v12 = vmul.f32 %v855_v0, %v584_v11 }
 0x36e   :  { %587 = vst [vmem:[%s1057_s9] sm:$0xff] %v586_v12 }
 0x36f   :  { %592 = vsyncpa [#allocation3], 1 }
 0x370   :  { %593 = vsyncpa [#allocation5], 1 }
 0x371   :  { %594 = vsyncpa [#allocation8], 1 }

</bundles_post_ra>
